<compile_context>
chip_gen: v7x
topology: tpu7x:2x2x1
jax: 0.10.0
libtpu: 0.0.40
codegen_flags: <defaults>
</compile_context>

<pallas_src>
import functools

import jax
import jax.numpy as jnp
from jax import lax
from jax.experimental import pallas as pl
from jax.experimental.pallas import tpu as pltpu


_LANE = 128
_TILE_BYTES_CAP = 2 * 1024 * 1024            # one (F, Tt) f32 tile <= ~2 MiB
_FUSED_VMEM_ESTIMATE_BUDGET = 16 * 1024 * 1024
_FUSED_VMEM_LIMIT = 30 * 1024 * 1024         # < v7x 64 MiB physical, raises v5e default
_TWO_PASS_VMEM_LIMIT = 32 * 1024 * 1024


# ----------------------------------------------------------------------------
# Fused single-pass kernel (x fully resident in VMEM).
# ----------------------------------------------------------------------------
def _fused_kernel(x_ref, w1_ref, b1_ref, w2_ref, b2_ref, o_ref, mm_ref):
    """Phase 1: per-batch w = MLP(x_b) stashed in the output buffer, global
    min/max accumulated in SMEM.  Phase 2: in-place normalize + multiply."""
    n_batch = x_ref.shape[0]

    mm_ref[0] = jnp.float32(jnp.inf)     # running min
    mm_ref[1] = jnp.float32(-jnp.inf)    # running max

    @pl.loop(0, n_batch)
    def _(b):
        xb = x_ref[b]                                                       # (F, T)
        h = jnp.dot(w1_ref[...], xb, preferred_element_type=jnp.float32)    # (H, T)
        h = jnp.maximum(h + b1_ref[...], 0.0)
        w = jnp.dot(w2_ref[...], h, preferred_element_type=jnp.float32)     # (F, T)
        w = w + b2_ref[...]
        o_ref[b] = w.astype(o_ref.dtype)          # stash w; no extra VMEM scratch
        mm_ref[0] = jnp.minimum(mm_ref[0], jnp.min(w))
        mm_ref[1] = jnp.maximum(mm_ref[1], jnp.max(w))

    g_min = mm_ref[0]
    # TODO(synk): matches PyTorch NormalizeData exactly; inf/NaN if w is constant.
    inv = 1.0 / (mm_ref[1] - g_min)

    @pl.loop(0, n_batch)
    def _(b):
        w = o_ref[b].astype(jnp.float32)
        o_ref[b] = (x_ref[b] * ((w - g_min) * inv)).astype(o_ref.dtype)


# ----------------------------------------------------------------------------
# Two-pass fallback kernels.
# ----------------------------------------------------------------------------
def _minmax_kernel(x_ref, w1_ref, b1_ref, w2_ref, b2_ref, mn_ref, mx_ref,
                   *, t_tile, t_valid):
    """Pass 1: per-batch elementwise running min/max of the MLP output.

    mn_ref / mx_ref are (1, F, 128) accumulators resident across the time axis
    (constant block index along t); the fold is 128-lane-aligned VPU work only —
    the final cross-lane reduce happens in the wrapper.
    """
    t = pl.program_id(1)

    @pl.when(t == 0)
    def _():
        mn_ref[...] = jnp.full_like(mn_ref, jnp.inf)
        mx_ref[...] = jnp.full_like(mx_ref, -jnp.inf)

    x = x_ref[0]                                                         # (F, Tt)
    h = jnp.dot(w1_ref[...], x, preferred_element_type=jnp.float32)     # (H, Tt)
    h = jnp.maximum(h + b1_ref[...], 0.0)
    w = jnp.dot(w2_ref[...], h, preferred_element_type=jnp.float32)     # (F, Tt)
    w = w + b2_ref[...]

    if t_valid is None:
        w_lo, w_hi = w, w
    else:
        # Wrapper padded T up to a multiple of 128; padded lanes must not
        # influence the global min/max.
        lane = lax.broadcasted_iota(jnp.int32, w.shape, 1) + t * t_tile
        valid = lane < t_valid
        w_lo = jnp.where(valid, w, jnp.inf)
        w_hi = jnp.where(valid, w, -jnp.inf)

    mn = mn_ref[0]
    mx = mx_ref[0]
    for j in range(t_tile // _LANE):                 # static, 128-lane aligned slices
        sl = slice(j * _LANE, (j + 1) * _LANE)
        mn = jnp.minimum(mn, w_lo[:, sl])
        mx = jnp.maximum(mx, w_hi[:, sl])
    mn_ref[0] = mn
    mx_ref[0] = mx


def _apply_kernel(stats_ref, x_ref, w1_ref, b1_ref, w2_ref, b2_ref, o_ref):
    """Pass 2: recompute w per tile, normalize with global stats, multiply, store."""
    x = x_ref[0]                                                         # (F, Tt)
    h = jnp.dot(w1_ref[...], x, preferred_element_type=jnp.float32)     # (H, Tt)
    h = jnp.maximum(h + b1_ref[...], 0.0)
    w = jnp.dot(w2_ref[...], h, preferred_element_type=jnp.float32)     # (F, Tt)
    w = w + b2_ref[...]
    w_min = stats_ref[0]
    inv = stats_ref[1]                    # 1 / (max - min), precomputed in wrapper
    o_ref[0] = (x * ((w - w_min) * inv)).astype(o_ref.dtype)


# ----------------------------------------------------------------------------
# Wrapper.
# ----------------------------------------------------------------------------
def _pick_time_tile(t_padded, f_len):
    """Largest lane-dense time tile with one (f_len, Tt) f32 tile <= ~2 MiB."""
    cap = max(_LANE, _TILE_BYTES_CAP // (4 * f_len))
    if t_padded <= cap:
        return t_padded                   # full (padded) extent as a single tile
    for cand in (8192, 4096, 2048, 1024, 512, 256, 128):
        if cand <= cap and t_padded % cand == 0:
            return cand
    return _LANE                          # t_padded is always a multiple of 128


def _weight_specs(h_len, f_len):
    # Constant block index -> weights stay VMEM-resident across all grid steps.
    return [
        pl.BlockSpec((h_len, f_len), lambda b, t: (0, 0)),
        pl.BlockSpec((h_len, 1), lambda b, t: (0, 0)),
        pl.BlockSpec((f_len, h_len), lambda b, t: (0, 0)),
        pl.BlockSpec((f_len, 1), lambda b, t: (0, 0)),
    ]


def freq_weight_forward(x, w1, b1, w2, b2, *, force_two_pass=False, time_tile=None):
    """x: (B, F, T) float32.  w1: (H, F), b1: (H,), w2: (F, H), b2: (F,)."""
    B, F_len, T = x.shape
    H = w1.shape[0]
    b1_2d = b1.reshape(H, 1).astype(jnp.float32)
    b2_2d = b2.reshape(F_len, 1).astype(jnp.float32)

    x_bytes = x.size * x.dtype.itemsize
    weight_bytes = 4 * (w1.size + w2.size + b1.size + b2.size)
    # x block + out block + ~3 per-batch f32 temporaries + weights.
    fused_estimate = 2 * x_bytes + 3 * (4 * F_len * T) + weight_bytes

    # ------------------------- fused single-pass path -------------------------
    if not force_two_pass and fused_estimate <= _FUSED_VMEM_ESTIMATE_BUDGET:
        full_spec = pl.BlockSpec((B, F_len, T), lambda i: (0, 0, 0))
        return pl.pallas_call(
            _fused_kernel,
            out_shape=jax.ShapeDtypeStruct((B, F_len, T), x.dtype),
            grid=(1,),
            in_specs=[
                full_spec,
                pl.BlockSpec((H, F_len), lambda i: (0, 0)),
                pl.BlockSpec((H, 1), lambda i: (0, 0)),
                pl.BlockSpec((F_len, H), lambda i: (0, 0)),
                pl.BlockSpec((F_len, 1), lambda i: (0, 0)),
            ],
            out_specs=full_spec,
            scratch_shapes=[pltpu.SMEM((2,), jnp.float32)],
            compiler_params=pltpu.CompilerParams(
                dimension_semantics=("arbitrary",),
                vmem_limit_bytes=_FUSED_VMEM_LIMIT),
        )(x, w1, b1_2d, w2, b2_2d)

    # --------------------------- two-pass fallback ----------------------------
    T_pad = ((T + _LANE - 1) // _LANE) * _LANE
    padded = T_pad != T
    x_in = jnp.pad(x, ((0, 0), (0, 0), (0, T_pad - T))) if padded else x

    Tt = time_tile if time_tile is not None else _pick_time_tile(T_pad, F_len)
    assert Tt % _LANE == 0 and T_pad % Tt == 0, (Tt, T_pad)
    nT = T_pad // Tt

    x_spec = pl.BlockSpec((1, F_len, Tt), lambda b, t: (b, 0, t))
    w_specs = _weight_specs(H, F_len)
    acc_spec = pl.BlockSpec((1, F_len, _LANE), lambda b, t: (b, 0, 0))

    # Pass 1: per-batch elementwise min/max partials (batch axis parallel).
    mn, mx = pl.pallas_call(
        functools.partial(_minmax_kernel, t_tile=Tt,
                          t_valid=(T if padded else None)),
        out_shape=(jax.ShapeDtypeStruct((B, F_len, _LANE), jnp.float32),
                   jax.ShapeDtypeStruct((B, F_len, _LANE), jnp.float32)),
        grid=(B, nT),
        in_specs=[x_spec] + w_specs,
        out_specs=(acc_spec, acc_spec),
        compiler_params=pltpu.CompilerParams(
            dimension_semantics=("parallel", "arbitrary"),
            vmem_limit_bytes=_TWO_PASS_VMEM_LIMIT),
    )(x_in, w1, b1_2d, w2, b2_2d)

    w_min = jnp.min(mn)
    w_max = jnp.max(mx)
    # TODO(synk): matches PyTorch NormalizeData exactly; inf/NaN if w is constant.
    stats = jnp.stack([w_min, 1.0 / (w_max - w_min)]).astype(jnp.float32)

    # Pass 2: normalize + multiply, embarrassingly parallel across tiles.
    out = pl.pallas_call(
        _apply_kernel,
        out_shape=jax.ShapeDtypeStruct((B, F_len, T_pad), x.dtype),
        grid=(B, nT),
        in_specs=[pl.BlockSpec(memory_space=pltpu.MemorySpace.SMEM), x_spec] + w_specs,
        out_specs=pl.BlockSpec((1, F_len, Tt), lambda b, t: (b, 0, t)),
        compiler_params=pltpu.CompilerParams(
            dimension_semantics=("parallel", "parallel"),
            vmem_limit_bytes=_TWO_PASS_VMEM_LIMIT),
    )(stats, x_in, w1, b1_2d, w2, b2_2d)

    if padded:
        out = out[:, :, :T]   # TODO(synk): extra slice copy only on the ragged-T path
    return out


def freq_weight_reference(x, w1, b1, w2, b2):
    """Pure-JAX reference mirroring the PyTorch forward."""
    xp = jnp.transpose(x, (0, 2, 1))                       # (B, T, F)
    h = jnp.maximum(xp @ w1.T + b1, 0.0)                   # (B, T, H)
    w = h @ w2.T + b2                                      # (B, T, F)
    w = (w - jnp.min(w)) / (jnp.max(w) - jnp.min(w))       # NormalizeData (global)
    w = jnp.transpose(w, (0, 2, 1))                        # (B, F, T)
    return x * w


if __name__ == "__main__":
    # Small shapes consistent with the module: freq_len=32, reduction=8 -> hidden=4.
    B, F_len, T = 2, 32, 256
    H = F_len // 8

    key = jax.random.PRNGKey(0)
    kx, k1, k2, k3, k4 = jax.random.split(key, 5)

    x = jax.random.normal(kx, (B, F_len, T), dtype=jnp.float32)

    # Deterministic PyTorch-style uniform init: U(-1/sqrt(fan_in), 1/sqrt(fan_in))
    bnd1 = 1.0 / (F_len ** 0.5)
    w1 = jax.random.uniform(k1, (H, F_len), jnp.float32, -bnd1, bnd1)  # Linear(F, H).weight
    b1 = jax.random.uniform(k2, (H,), jnp.float32, -bnd1, bnd1)        # Linear(F, H).bias
    bnd2 = 1.0 / (H ** 0.5)
    w2 = jax.random.uniform(k3, (F_len, H), jnp.float32, -bnd2, bnd2)  # Linear(H, F).weight
    b2 = jax.random.uniform(k4, (F_len,), jnp.float32, -bnd2, bnd2)    # Linear(H, F).bias

    ref = freq_weight_reference(x, w1, b1, w2, b2)

    # 1) fused single-pass path (x resident in VMEM, 1 read + 1 write).
    out = jax.block_until_ready(freq_weight_forward(x, w1, b1, w2, b2))
    assert out.shape == (B, F_len, T)
    assert jnp.allclose(out, ref, atol=2e-5, rtol=2e-5), "fused path mismatch"

    # 2) two-pass fallback with multiple time tiles per batch (accumulator pattern).
    out2 = jax.block_until_ready(
        freq_weight_forward(x, w1, b1, w2, b2, force_two_pass=True, time_tile=128))
    assert jnp.allclose(out2, ref, atol=2e-5, rtol=2e-5), "two-pass path mismatch"

    # 3) two-pass fallback with ragged T (exercises 128-padding + min/max masking).
    Tr = 200
    xr = x[:, :, :Tr]
    refr = freq_weight_reference(xr, w1, b1, w2, b2)
    outr = jax.block_until_ready(
        freq_weight_forward(xr, w1, b1, w2, b2, force_two_pass=True, time_tile=128))
    assert outr.shape == (B, F_len, Tr)
    assert jnp.allclose(outr, refr, atol=2e-5, rtol=2e-5), "ragged two-pass mismatch"

    # 4) fused path with ragged T (full-extent blocks, no padding needed).
    outr_f = jax.block_until_ready(freq_weight_forward(xr, w1, b1, w2, b2))
    assert jnp.allclose(outr_f, refr, atol=2e-5, rtol=2e-5), "ragged fused mismatch"

    print("KERNEL_OK")
</pallas_src>

<mosaic_0001>
module attributes {stable_mosaic.version = 11 : i64} {
  func.func @_fused_kernel(%arg0: i32, %arg1: memref<2x32x256xf32, #tpu.memory_space<vmem>>, %arg2: memref<4x32xf32, #tpu.memory_space<vmem>>, %arg3: memref<4x1xf32, #tpu.memory_space<vmem>>, %arg4: memref<32x4xf32, #tpu.memory_space<vmem>>, %arg5: memref<32x1xf32, #tpu.memory_space<vmem>>, %arg6: memref<2x32x256xf32, #tpu.memory_space<vmem>>, %arg7: memref<2xf32, #tpu.memory_space<smem>>) attributes {dimension_semantics = [#tpu.dimension_semantics<arbitrary>], iteration_bounds = array<i64: 1>, scalar_prefetch = 0 : i64, scratch_operands = 1 : i64, tpu.core_type = #tpu.core_type<tc>, window_params = [{pipeline_mode = #tpu.pipeline_mode<synchronous>, transform_indices = @transform_0, window_bounds = array<i64: 2, 32, 256>}, {pipeline_mode = #tpu.pipeline_mode<synchronous>, transform_indices = @transform_1, window_bounds = array<i64: 4, 32>}, {pipeline_mode = #tpu.pipeline_mode<synchronous>, transform_indices = @transform_2, window_bounds = array<i64: 4, 1>}, {pipeline_mode = #tpu.pipeline_mode<synchronous>, transform_indices = @transform_3, window_bounds = array<i64: 32, 4>}, {pipeline_mode = #tpu.pipeline_mode<synchronous>, transform_indices = @transform_4, window_bounds = array<i64: 32, 1>}, {pipeline_mode = #tpu.pipeline_mode<synchronous>, transform_indices = @transform_5, window_bounds = array<i64: 2, 32, 256>}]} {
    %cst = arith.constant 0x7F800000 : f32
    %c0 = arith.constant 0 : index
    %0 = memref.load %arg7[%c0] : memref<2xf32, #tpu.memory_space<smem>>
    memref.store %cst, %arg7[%c0] : memref<2xf32, #tpu.memory_space<smem>>
    %cst_0 = arith.constant 0xFF800000 : f32
    %c1 = arith.constant 1 : index
    %1 = memref.load %arg7[%c1] : memref<2xf32, #tpu.memory_space<smem>>
    memref.store %cst_0, %arg7[%c1] : memref<2xf32, #tpu.memory_space<smem>>
    %c0_i32 = arith.constant 0 : i32
    %c2_i32 = arith.constant 2 : i32
    %2 = arith.addi %c0_i32, %c2_i32 : i32
    %c1_i32 = arith.constant 1 : i32
    scf.for %arg8 = %c0_i32 to %2 step %c1_i32  : i32 {
      %c1_i32_9 = arith.constant 1 : i32
      %8 = arith.muli %arg8, %c1_i32_9 : i32
      %c0_i32_10 = arith.constant 0 : i32
      %9 = arith.addi %c0_i32_10, %8 : i32
      %10 = arith.index_cast %9 : i32 to index
      %c0_11 = arith.constant 0 : index
      %c0_12 = arith.constant 0 : index
      %11 = vector.load %arg1[%10, %c0_11, %c0_12] : memref<2x32x256xf32, #tpu.memory_space<vmem>>, vector<1x32x256xf32>
      %12 = vector.shape_cast %11 : vector<1x32x256xf32> to vector<32x256xf32>
      %c0_13 = arith.constant 0 : index
      %c0_14 = arith.constant 0 : index
      %13 = vector.load %arg2[%c0_13, %c0_14] : memref<4x32xf32, #tpu.memory_space<vmem>>, vector<4x32xf32>
      %cst_15 = arith.constant dense<0.000000e+00> : vector<4x256xf32>
      %14 = tpu.matmul %13, %12, %cst_15 {dimension_numbers = #tpu.dot_dimension_numbers<[1], [0], [0], [1], [0, 0, 1, 1], [], []>} : vector<4x32xf32>, vector<32x256xf32>, vector<4x256xf32> -> vector<4x256xf32>
      %c0_16 = arith.constant 0 : index
      %c0_17 = arith.constant 0 : index
      %15 = vector.load %arg3[%c0_16, %c0_17] : memref<4x1xf32, #tpu.memory_space<vmem>>, vector<4x1xf32>
      %16 = vector.broadcast %15 : vector<4x1xf32> to vector<4x256xf32>
      %17 = arith.addf %14, %16 : vector<4x256xf32>
      %cst_18 = arith.constant 0.000000e+00 : f32
      %18 = vector.broadcast %cst_18 : f32 to vector<4x256xf32>
      %19 = arith.maximumf %17, %18 : vector<4x256xf32>
      %c0_19 = arith.constant 0 : index
      %c0_20 = arith.constant 0 : index
      %20 = vector.load %arg4[%c0_19, %c0_20] : memref<32x4xf32, #tpu.memory_space<vmem>>, vector<32x4xf32>
      %cst_21 = arith.constant dense<0.000000e+00> : vector<32x256xf32>
      %21 = tpu.matmul %20, %19, %cst_21 {dimension_numbers = #tpu.dot_dimension_numbers<[1], [0], [0], [1], [0, 0, 1, 1], [], []>} : vector<32x4xf32>, vector<4x256xf32>, vector<32x256xf32> -> vector<32x256xf32>
      %c0_22 = arith.constant 0 : index
      %c0_23 = arith.constant 0 : index
      %22 = vector.load %arg5[%c0_22, %c0_23] : memref<32x1xf32, #tpu.memory_space<vmem>>, vector<32x1xf32>
      %23 = vector.broadcast %22 : vector<32x1xf32> to vector<32x256xf32>
      %24 = arith.addf %21, %23 : vector<32x256xf32>
      %25 = arith.index_cast %9 : i32 to index
      %c0_24 = arith.constant 0 : index
      %c0_25 = arith.constant 0 : index
      %26 = vector.load %arg6[%25, %c0_24, %c0_25] : memref<2x32x256xf32, #tpu.memory_space<vmem>>, vector<1x32x256xf32>
      %27 = vector.shape_cast %26 : vector<1x32x256xf32> to vector<32x256xf32>
      %28 = vector.shape_cast %24 : vector<32x256xf32> to vector<1x32x256xf32>
      tpu.vector_store %arg6[%25, %c0_24, %c0_25], %28 {strides = array<i32>} : memref<2x32x256xf32, #tpu.memory_space<vmem>>, vector<1x32x256xf32>,
      %c0_26 = arith.constant 0 : index
      %29 = memref.load %arg7[%c0_26] : memref<2xf32, #tpu.memory_space<smem>>
      %30 = vector.shape_cast %24 : vector<32x256xf32> to vector<1x32x256xf32>
      %cst_27 = arith.constant dense<0x7F800000> : vector<1xf32>
      %31 = vector.multi_reduction <minimumf>, %30, %cst_27 [1, 2] : vector<1x32x256xf32> to vector<1xf32>
      %32 = vector.shape_cast %31 : vector<1xf32> to vector<1x1x1xf32>
      %33 = vector.extract %32[0, 0, 0] : f32 from vector<1x1x1xf32>
      %34 = arith.minimumf %29, %33 : f32
      %c0_28 = arith.constant 0 : index
      %35 = memref.load %arg7[%c0_28] : memref<2xf32, #tpu.memory_space<smem>>
      memref.store %34, %arg7[%c0_28] : memref<2xf32, #tpu.memory_space<smem>>
      %c1_29 = arith.constant 1 : index
      %36 = memref.load %arg7[%c1_29] : memref<2xf32, #tpu.memory_space<smem>>
      %37 = vector.shape_cast %24 : vector<32x256xf32> to vector<1x32x256xf32>
      %cst_30 = arith.constant dense<0xFF800000> : vector<1xf32>
      %38 = vector.multi_reduction <maximumf>, %37, %cst_30 [1, 2] : vector<1x32x256xf32> to vector<1xf32>
      %39 = vector.shape_cast %38 : vector<1xf32> to vector<1x1x1xf32>
      %40 = vector.extract %39[0, 0, 0] : f32 from vector<1x1x1xf32>
      %41 = arith.maximumf %36, %40 : f32
      %c1_31 = arith.constant 1 : index
      %42 = memref.load %arg7[%c1_31] : memref<2xf32, #tpu.memory_space<smem>>
      memref.store %41, %arg7[%c1_31] : memref<2xf32, #tpu.memory_space<smem>>
    }
    %c2_i32_1 = arith.constant 2 : i32
    %c0_2 = arith.constant 0 : index
    %3 = memref.load %arg7[%c0_2] : memref<2xf32, #tpu.memory_space<smem>>
    %c1_3 = arith.constant 1 : index
    %4 = memref.load %arg7[%c1_3] : memref<2xf32, #tpu.memory_space<smem>>
    %5 = arith.subf %4, %3 : f32
    %cst_4 = arith.constant 1.000000e+00 : f32
    %6 = arith.divf %cst_4, %5 : f32
    %c0_i32_5 = arith.constant 0 : i32
    %c2_i32_6 = arith.constant 2 : i32
    %7 = arith.addi %c0_i32_5, %c2_i32_6 : i32
    %c1_i32_7 = arith.constant 1 : i32
    scf.for %arg8 = %c0_i32_5 to %7 step %c1_i32_7  : i32 {
      %c1_i32_9 = arith.constant 1 : i32
      %8 = arith.muli %arg8, %c1_i32_9 : i32
      %c0_i32_10 = arith.constant 0 : i32
      %9 = arith.addi %c0_i32_10, %8 : i32
      %10 = arith.index_cast %9 : i32 to index
      %c0_11 = arith.constant 0 : index
      %c0_12 = arith.constant 0 : index
      %11 = vector.load %arg6[%10, %c0_11, %c0_12] : memref<2x32x256xf32, #tpu.memory_space<vmem>>, vector<1x32x256xf32>
      %12 = vector.shape_cast %11 : vector<1x32x256xf32> to vector<32x256xf32>
      %13 = arith.index_cast %9 : i32 to index
      %c0_13 = arith.constant 0 : index
      %c0_14 = arith.constant 0 : index
      %14 = vector.load %arg1[%13, %c0_13, %c0_14] : memref<2x32x256xf32, #tpu.memory_space<vmem>>, vector<1x32x256xf32>
      %15 = vector.shape_cast %14 : vector<1x32x256xf32> to vector<32x256xf32>
      %16 = vector.broadcast %3 : f32 to vector<32x256xf32>
      %17 = arith.subf %12, %16 : vector<32x256xf32>
      %18 = vector.broadcast %6 : f32 to vector<32x256xf32>
      %19 = arith.mulf %17, %18 : vector<32x256xf32>
      %20 = arith.mulf %15, %19 : vector<32x256xf32>
      %21 = arith.index_cast %9 : i32 to index
      %c0_15 = arith.constant 0 : index
      %c0_16 = arith.constant 0 : index
      %22 = vector.load %arg6[%21, %c0_15, %c0_16] : memref<2x32x256xf32, #tpu.memory_space<vmem>>, vector<1x32x256xf32>
      %23 = vector.shape_cast %22 : vector<1x32x256xf32> to vector<32x256xf32>
      %24 = vector.shape_cast %20 : vector<32x256xf32> to vector<1x32x256xf32>
      tpu.vector_store %arg6[%21, %c0_15, %c0_16], %24 {strides = array<i32>} : memref<2x32x256xf32, #tpu.memory_space<vmem>>, vector<1x32x256xf32>,
    }
    %c2_i32_8 = arith.constant 2 : i32
    return
  }
  func.func @transform_0(%arg0: i32) -> (i32, i32, i32) {
    %c0_i32 = arith.constant 0 : i32
    %c0_i32_0 = arith.constant 0 : i32
    %c0_i32_1 = arith.constant 0 : i32
    %c0_i32_2 = arith.constant 0 : i32
    return %c0_i32, %c0_i32_0, %c0_i32_1 : i32, i32, i32
  }
  func.func @transform_1(%arg0: i32) -> (i32, i32) {
    %c0_i32 = arith.constant 0 : i32
    %c0_i32_0 = arith.constant 0 : i32
    %c0_i32_1 = arith.constant 0 : i32
    return %c0_i32, %c0_i32_0 : i32, i32
  }
  func.func @transform_2(%arg0: i32) -> (i32, i32) {
    %c0_i32 = arith.constant 0 : i32
    %c0_i32_0 = arith.constant 0 : i32
    %c0_i32_1 = arith.constant 0 : i32
    return %c0_i32, %c0_i32_0 : i32, i32
  }
  func.func @transform_3(%arg0: i32) -> (i32, i32) {
    %c0_i32 = arith.constant 0 : i32
    %c0_i32_0 = arith.constant 0 : i32
    %c0_i32_1 = arith.constant 0 : i32
    return %c0_i32, %c0_i32_0 : i32, i32
  }
  func.func @transform_4(%arg0: i32) -> (i32, i32) {
    %c0_i32 = arith.constant 0 : i32
    %c0_i32_0 = arith.constant 0 : i32
    %c0_i32_1 = arith.constant 0 : i32
    return %c0_i32, %c0_i32_0 : i32, i32
  }
  func.func @transform_5(%arg0: i32) -> (i32, i32, i32) {
    %c0_i32 = arith.constant 0 : i32
    %c0_i32_0 = arith.constant 0 : i32
    %c0_i32_1 = arith.constant 0 : i32
    %c0_i32_2 = arith.constant 0 : i32
    return %c0_i32, %c0_i32_0, %c0_i32_1 : i32, i32, i32
  }
}

</mosaic_0001>

<bundles_post_ra>
// kernel: tpu_custom_call.1
= control target key start
LH: loop header
LB: loop body
LE: loop exit
PB: predicated region body
PF: predicated region fallthrough
CT: control target
= control target key end

     0   :  { %10 = vsyncpa [#allocation4], 0  ;;  %s707_s0 = inlined_call_operand.hbm [shape: f32[2,32,256], index: 0, kind: input, shape index: {}]   ;;  %s708_s1 = inlined_call_operand.vmem [shape: f32[4,32], index: 1, kind: input, shape index: {}]   ;;  %s709_s2 = inlined_call_operand.vmem [shape: f32[4,1], index: 2, kind: input, shape index: {}]   ;;  %s710_s3 = inlined_call_operand.vmem [shape: f32[32,4], index: 3, kind: input, shape index: {}]   ;;  %s711_s4 = inlined_call_operand.vmem [shape: f32[32,1], index: 4, kind: input, shape index: {}]   ;;  %s712_s5 = inlined_call_operand.hbm [shape: f32[2,32,256], index: 5, kind: output, shape index: {}]  }
   0x1   :  { %11 = vsyncpa [#allocation5], 0  ;;  %s552_s18 = smov [#allocation3]   ;;  %s488_s22 = scalar_lea.hbm %s707_s0, 2048 }
   0x2   :  { %s17_s19 = sshll.u32 %s552_s18, 4  ;;  %p489_p0 = scmp.ne.s32.totalorder %s707_s0, %s488_s22  ;;  %s18_s19 = int_to_ptr.vmem [resolvable:$true] %s17_s19 }
   0x3   :  { %p492_p1 = scmp.lt.u32.totalorder %s488_s22, %s707_s0 }
   0x5   :  { %p494_p2 = pnand %p492_p1, %p489_p0 }
   0x7   :  { %497 = shalt.err (!%p494_p2)
}
   0x8   :  { %s498_s27 = scalar_lea.vmem %s18_s19, 2048  ;;  %p503_p4 = scmp.lt.s32.totalorder %s18_s19, %s18_s19 }
   0x9   :  { %p499_p3 = scmp.ne.s32.totalorder %s18_s19, %s498_s27  ;;  %p504_p5 = scmp.lt.s32.totalorder %s498_s27, %s498_s27 }
   0xb   :  { %p505_p6 = por %p504_p5, %p503_p4 }
   0xd   :  { %p506_p7 = pnand %p505_p6, %p499_p3 }
   0xf   :  { %509 = shalt.err (!%p506_p7)
}
  0x10   :  { %s553_s28 = smov 256   ;;  %s554_s29 = smov 16  }
  0x11   :  { %23 = dma.hbm_to_vmem [thread:$0]  %s707_s0, 2048, %s18_s19, [#allocation4], %s553_s28, %s553_s28, %s554_s29  }
  0x12   :  { %540 = dma.done.wait [#allocation4], 2048  }
  0x13   :  { %541 = vsyncadd [#allocation4], 4294965248  ;;  %s555_s7 = smov inf   ;;  %s556_s8 = smov -inf  }
  0x14   :  { %36 = sst [smem:[#allocation2]] %s555_s7  ;;  %s605_s9 = smov 0  }
  0x15   :  { %38 = sst [smem:[#allocation2 + $0x1]] %s556_s8 }
  0x16 LB: > { %v557_v0 = vmov 0.0   ;;  %v558_v1 = vmov 0   ;;  %v57_v2 = vld [vmem:[%s709_s2] sm:$0xf]  ;;  %s442_s11 = sshll.u32 %s546_s9, 6  ;;  %v147_v15 = vld [vmem:[%s711_s4 + $0x18] sm:$0xff]  ;;  %s546_s9 = sphi %s605_s9, %s44_s9  }
  0x17   : > { %131 = vmatprep.mubr.f32.mxu0 %v557_v0  ;;  %484 = vset.pattern.permute.xlu0 %v558_v1  ;;  %v144_v3 = vld [vmem:[%s711_s4] sm:$0xff]  ;;  %s47_s14 = scalar_lea.vmem [#allocation3], %s442_s11  ;;  %vm63_vm0 = vcmask 261120   ;;  %v145_v18 = vld [vmem:[%s711_s4 + $0x8] sm:$0xff]  ;;  %v146_v19 = vld [vmem:[%s711_s4 + $0x10] sm:$0xff]  ;;  %vm181_vm1 = vcmask 1043456  }
  0x18   : > { %60 = vperm.xlu0 %484, %v57_v2   ;;  %252 = vmatprep.mubr.f32.mxu1 %v557_v0  ;;  %v49_v4 = vld [vmem:[%s47_s14 + $0x8] sm:$0xff]  ;;  %v51_v5 = vld [vmem:[%s47_s14 + $0x18] sm:$0xff]  ;;  %v48_v6 = vld [vmem:[%s47_s14] sm:$0xff]  ;;  %vm168_vm2 = vcmask 31744   ;;  %s278_s8 = scalar_lea.vmem [#allocation6], %s442_s11  ;;  %s287_s0 = sld [smem:[#allocation2]] }
  0x19   : > { %485 = vset.pattern.permute.xlu1 %v558_v1  ;;  %v446_v7 = vpack.c.bf16 %v51_v5, %v49_v4  ;;  %v50_v8 = vld [vmem:[%s47_s14 + $0x10] sm:$0xff]  ;;  %v53_v9 = vld [vmem:[%s47_s14 + $0x28] sm:$0xff]  ;;  %v55_v10 = vld [vmem:[%s47_s14 + $0x38] sm:$0xff]  ;;  %s437_s10 = sld [smem:[#allocation2 + $0x1]]  ;;  %s44_s9 = sadd.s32 1, %s546_s9  }
  0x1a   : > { %v448_v11 = vpack.c.bf16 %v50_v8, %v48_v6  ;;  %v450_v12 = vpack.c.bf16 %v55_v10, %v53_v9  ;;  %v52_v13 = vld [vmem:[%s47_s14 + $0x20] sm:$0xff]  ;;  %v54_v14 = vld [vmem:[%s47_s14 + $0x30] sm:$0xff]  ;;  %155 = vperm.xlu1 %485, %v145_v18   ;;  %v141_v28 = vld [vmem:[%s710_s3 + $0x8] sm:$0xff]  ;;  %p41_p8 = scmp.ge.s32.totalorder %s44_s9, 2  }
  0x1b   : > { %447 = vmatprep.subr.bf16.mxu0 %v446_v7  ;;  %v452_v16 = vpack.c.bf16 %v54_v14, %v52_v13  ;;  %v56_v17 = vld [vmem:[%s708_s1] sm:$0xf]  ;;  %v142_v29 = vld [vmem:[%s710_s3 + $0x10] sm:$0xff]  ;;  %v143_v30 = vld [vmem:[%s710_s3 + $0x18] sm:$0xff]  ;;  %s653_s19 = smov (%p41_p8), 0  }
  0x1c   : > { %150 = vperm.xlu0 %484, %v144_v3   ;;  %449 = vmatpush1.bf16.msra.mxu0 %v448_v11  ;;  %v140_v27 = vld [vmem:[%s710_s3] sm:$0xff] }
  0x1d   : > { %451 = vmatprep.subr.bf16.mxu0 %v450_v12 }
  0x1e   : > { %160 = vperm.xlu1 %485, %v146_v19  }
  0x20   : > { %165 = vperm.xlu0 %484, %v147_v15   ;;  %453 = vmatpush1.bf16.msra.mxu0 %v452_v16 }
  0x23   : > { %429 = vmatmul.mubr.msk.f32.vlgmr.msra.gmra.mrb[0].mxu0 %vm63_vm0, %v56_v17 }
  0x97   : > { %v61_v20 = vpop.permute.xlu0 %60 }
  0x99   : > { %v156_v33 = vpop.permute.xlu1 %155 }
  0x9b   : > { %v151_v31 = vpop.permute.xlu0 %150 }
  0x9d   : > { %v161_v41 = vpop.permute.xlu1 %160 }
  0x9f   : > { %v166_v48 = vpop.permute.xlu0 %165 }
  0xf6   : > { %v133_v21 = vpop.f32.mrb[0].mxu0 }
  0xf7   : > { %v134_v22 = vadd.f32 %v133_v21, %v61_v20  ;;  %v135_v23 = vpop.f32.mrb[1].mxu0 }
  0xf8   : > { %v136_v24 = vadd.f32 %v135_v23, %v61_v20 }
  0xf9   : > { %v138_v26 = vmax.f32 %v134_v22, 0.0 }
  0xfa   : > { %v139_v25 = vmax.f32 %v136_v24, 0.0 }
  0xfc   : > { %430 = vmatprep.subr.msk.mxu1 %vm181_vm1, %v139_v25 }
  0xfd   : > { %431 = vmatpush1.msk.msra.mxu1 %vm181_vm1, %v138_v26 }
  0xfe   : > { %432 = vmatmul.mubr.msk.f32.vlgmr.msra.gmra.mrb[0].mxu1 %vm168_vm2, %v140_v27 }
  0xff   : > { %258 = vmatprep.mubr.f32.mxu1 %v557_v0 }
 0x102   : > { %433 = vmatmul.mubr.msk.f32.gmra.mrb[2].mxu1 %vm168_vm2, %v141_v28 }
 0x103   : > { %264 = vmatprep.mubr.f32.mxu1 %v557_v0 }
 0x106   : > { %434 = vmatmul.mubr.msk.f32.gmra.mrb[4].mxu1 %vm168_vm2, %v142_v29 }
 0x107   : > { %270 = vmatprep.mubr.f32.mxu1 %v557_v0 }
 0x10a   : > { %435 = vmatmul.mubr.msk.f32.gmra.mrb[6].mxu1 %vm168_vm2, %v143_v30 }
 0x1d1   : > { %v254_v32 = vpop.f32.mrb[0].mxu1 }
 0x1d2   : > { %v255_v34 = vadd.f32 %v254_v32, %v151_v31  ;;  %v256_v35 = vpop.f32.mrb[1].mxu1 }
 0x1d3   : > { %v257_v36 = vadd.f32 %v256_v35, %v151_v31 }
 0x1d4   : > { %279 = vst [vmem:[%s278_s8] sm:$0xff] %v255_v34 }
 0x1d5   : > { %280 = vst [vmem:[%s278_s8 + $0x8] sm:$0xff] %v257_v36  ;;  %v260_v37 = vpop.f32.mrb[2].mxu1 }
 0x1d6   : > { %v261_v38 = vadd.f32 %v260_v37, %v156_v33  ;;  %v262_v39 = vpop.f32.mrb[3].mxu1 }
 0x1d7   : > { %v263_v40 = vadd.f32 %v262_v39, %v156_v33 }
 0x1d8   : > { %281 = vst [vmem:[%s278_s8 + $0x10] sm:$0xff] %v261_v38 }
 0x1d9   : > { %282 = vst [vmem:[%s278_s8 + $0x18] sm:$0xff] %v263_v40  ;;  %v266_v42 = vpop.f32.mrb[4].mxu1 }
 0x1da   : > { %v267_v43 = vadd.f32 %v266_v42, %v161_v41  ;;  %v268_v44 = vpop.f32.mrb[5].mxu1 }
 0x1db   : > { %v269_v45 = vadd.f32 %v268_v44, %v161_v41 }
 0x1dc   : > { %283 = vst [vmem:[%s278_s8 + $0x20] sm:$0xff] %v267_v43  ;;  %v288_v46 = vmin.f32 %v255_v34, %v267_v43  ;;  %v307_v47 = vmax.f32 %v255_v34, %v267_v43 }
 0x1dd   : > { %284 = vst [vmem:[%s278_s8 + $0x28] sm:$0xff] %v269_v45  ;;  %v289_v49 = vmin.f32 %v257_v36, %v269_v45  ;;  %v308_v50 = vmax.f32 %v257_v36, %v269_v45  ;;  %v272_v51 = vpop.f32.mrb[6].mxu1 }
 0x1de   : > { %v273_v52 = vadd.f32 %v272_v51, %v166_v48  ;;  %v274_v53 = vpop.f32.mrb[7].mxu1 }
 0x1df   : > { %v275_v54 = vadd.f32 %v274_v53, %v166_v48  ;;  %v311_v55 = vmax.f32 %v307_v47, %v308_v50  ;;  %v292_v56 = vmin.f32 %v288_v46, %v289_v49 }
 0x1e0   : > { %285 = vst [vmem:[%s278_s8 + $0x30] sm:$0xff] %v273_v52  ;;  %v290_v57 = vmin.f32 %v261_v38, %v273_v52  ;;  %v309_v58 = vmax.f32 %v261_v38, %v273_v52 }
 0x1e1   : > { %286 = vst [vmem:[%s278_s8 + $0x38] sm:$0xff] %v275_v54  ;;  %v291_v59 = vmin.f32 %v263_v40, %v275_v54  ;;  %v310_v60 = vmax.f32 %v263_v40, %v275_v54 }
 0x1e3   : > { %v312_v61 = vmax.f32 %v309_v58, %v310_v60  ;;  %v293_v62 = vmin.f32 %v290_v57, %v291_v59 }
 0x1e5   : > { %v313_v63 = vmax.f32 %v311_v55, %v312_v61  ;;  %v294_v0 = vmin.f32 %v292_v56, %v293_v62 }
 0x1e7   : > { %314 = vmax.xlane.f32.xlu0 %v313_v63  ;;  %295 = vmin.xlane.f32.xlu1 %v294_v0 }
 0x274   : > { %v315_v1 = vpop.xlane.xlu0 %314  ;;  %v296_v2 = vpop.xlane.xlu1 %295 }
 0x275   : > { %v316_v3 = vrot.slane %v315_v1, 4  ;;  %v297_v4 = vrot.slane %v296_v2, 4 }
 0x277   : > { %v317_v5 = vmax.f32 %v315_v1, %v316_v3  ;;  %v298_v6 = vmin.f32 %v296_v2, %v297_v4 }
 0x279   : > { %v318_v7 = vrot.slane %v317_v5, 2  ;;  %v299_v8 = vrot.slane %v298_v6, 2 }
 0x27b   : > { %v319_v9 = vmax.f32 %v317_v5, %v318_v7  ;;  %v300_v10 = vmin.f32 %v298_v6, %v299_v8 }
 0x27d   : > { %v301_v11 = vrot.slane %v300_v10, 1  ;;  %v320_v12 = vrot.slane %v319_v9, 1 }
 0x27f   : > { %v302_v13 = vmin.f32 %v300_v10, %v301_v11  ;;  %v321_v14 = vmax.f32 %v319_v9, %v320_v12 }
 0x281   : > { %454 = vpush %v302_v13 }
 0x282   : > { %456 = vpush %v321_v14 }
 0x2af   :  { %43 = sbr.rel (!%p41_p8) target bundleno = 22 (0x16), region = 64 }
 0x2b2   : > { %s455_s11 = spop %454 }
 0x2b3   : > { %s304_s12 = smin.f32 %s455_s11, %s287_s0  ;;  %s457_s13 = spop %456 }
 0x2b4   : > { %305 = sst [smem:[#allocation2]] %s304_s12  ;;  %s323_s14 = smax.f32 %s457_s13, %s437_s10 }
 0x2b5   : > { %324 = sst [smem:[#allocation2 + $0x1]] %s323_s14  ;;  %s648_s15 = sld [smem:[#allocation2]] (%p41_p8) }
 0x2b6   :  { %s438_s16 = sld [smem:[#allocation2 + $0x1]] }
 0x2bc   :  { %s327_s17 = ssub.f32 %s438_s16, %s648_s15 }
 0x2be   :  { %v328_v15 = vstv %s327_s17 }
 0x2bf   :  { %486 = vrcp.f32 %v328_v15 }
 0x2c9   :  { %v487_v16 = vpop.eup %486 }
 0x2ca   :  { %458 = vpush %v487_v16 }
 0x2fb   :  { %s651_s18 = spop %458 }
 0x2fc LB: > { %s444_s1 = sshll.u32 %s550_s19, 6  ;;  %v358_v17 = vstv %s648_s15  ;;  %v367_v19 = vstv %s651_s18  ;;  %s336_s19 = sadd.s32 1, %s550_s19   ;;  %s550_s19 = sphi %s653_s19, %s336_s19  }
 0x2fd   : > { %s660_s2 = scalar_lea.vmem [#allocation6], %s444_s1  ;;  %s665_s3 = scalar_lea.vmem [#allocation3], %s444_s1 }
 0x2fe   : > { %v340_v18 = vld [vmem:[%s660_s2] sm:$0xff]  ;;  %v341_v20 = vld [vmem:[%s660_s2 + $0x8] sm:$0xff]  ;;  %v342_v24 = vld [vmem:[%s660_s2 + $0x10] sm:$0xff]  ;;  %p333_p9 = scmp.ge.s32.totalorder %s336_s19, 2  }
 0x2ff   : > { %v350_v21 = vld [vmem:[%s665_s3] sm:$0xff]  ;;  %v359_v22 = vsub.f32 %v340_v18, %v358_v17  ;;  %v360_v23 = vsub.f32 %v341_v20, %v358_v17  ;;  %v351_v25 = vld [vmem:[%s665_s3 + $0x8] sm:$0xff]  ;;  %v361_v26 = vsub.f32 %v342_v24, %v358_v17  ;;  %v343_v27 = vld [vmem:[%s660_s2 + $0x18] sm:$0xff]  ;;  %s559_s4 = smov (%p333_p9), [#allocation6]  }
 0x300   : > { %v344_v28 = vld [vmem:[%s660_s2 + $0x20] sm:$0xff]  ;;  %v352_v31 = vld [vmem:[%s665_s3 + $0x10] sm:$0xff]  ;;  %v353_v32 = vld [vmem:[%s665_s3 + $0x18] sm:$0xff]  ;;  %v362_v33 = vsub.f32 %v343_v27, %v358_v17  ;;  %s397_s9 = sshll.u32 (%p333_p9), %s559_s4, 4  ;;  %s398_s9 = int_to_ptr.vmem [resolvable:$true] %s397_s9 }
 0x301   : > { %v368_v29 = vmul.f32 %v367_v19, %v359_v22  ;;  %v369_v30 = vmul.f32 %v367_v19, %v360_v23  ;;  %v363_v34 = vsub.f32 %v344_v28, %v358_v17  ;;  %v345_v35 = vld [vmem:[%s660_s2 + $0x28] sm:$0xff]  ;;  %v370_v36 = vmul.f32 %v367_v19, %v361_v26  ;;  %v354_v37 = vld [vmem:[%s665_s3 + $0x20] sm:$0xff]  ;;  %v346_v39 = vld [vmem:[%s660_s2 + $0x30] sm:$0xff]  ;;  %s510_s20 = scalar_lea.vmem (%p333_p9), %s398_s9, 2048  ;;  %p515_p11 = scmp.lt.s32.totalorder (%p333_p9), %s398_s9, %s398_s9 }
 0x302   : > { %v364_v38 = vsub.f32 %v345_v35, %v358_v17  ;;  %v347_v40 = vld [vmem:[%s660_s2 + $0x38] sm:$0xff]  ;;  %v371_v43 = vmul.f32 %v367_v19, %v362_v33  ;;  %v355_v45 = vld [vmem:[%s665_s3 + $0x28] sm:$0xff]  ;;  %v365_v48 = vsub.f32 %v346_v39, %v358_v17  ;;  %v356_v52 = vld [vmem:[%s665_s3 + $0x30] sm:$0xff]  ;;  %p511_p10 = scmp.ne.s32.totalorder (%p333_p9), %s398_s9, %s510_s20  ;;  %p516_p12 = scmp.lt.s32.totalorder (%p333_p9), %s510_s20, %s510_s20 }
 0x303   : > { %v376_v41 = vmul.f32 %v368_v29, %v350_v21  ;;  %v377_v42 = vmul.f32 %v369_v30, %v351_v25  ;;  %v372_v44 = vmul.f32 %v367_v19, %v363_v34  ;;  %v378_v46 = vmul.f32 %v370_v36, %v352_v31  ;;  %v357_v53 = vld [vmem:[%s665_s3 + $0x38] sm:$0xff] }
 0x304   : > { %v373_v47 = vmul.f32 %v367_v19, %v364_v38  ;;  %v366_v49 = vsub.f32 %v347_v40, %v358_v17  ;;  %v379_v50 = vmul.f32 %v371_v43, %v353_v32  ;;  %v374_v55 = vmul.f32 %v367_v19, %v365_v48  ;;  %p517_p13 = por (%p333_p9), %p516_p12, %p515_p11 }
 0x305   : > { %384 = vst [vmem:[%s660_s2] sm:$0xff] %v376_v41  ;;  %385 = vst [vmem:[%s660_s2 + $0x8] sm:$0xff] %v377_v42  ;;  %v380_v51 = vmul.f32 %v372_v44, %v354_v37 }
 0x306   : > { %386 = vst [vmem:[%s660_s2 + $0x10] sm:$0xff] %v378_v46  ;;  %v381_v54 = vmul.f32 %v373_v47, %v355_v45  ;;  %v375_v56 = vmul.f32 %v367_v19, %v366_v49  ;;  %387 = vst [vmem:[%s660_s2 + $0x18] sm:$0xff] %v379_v50  ;;  %v382_v57 = vmul.f32 %v374_v55, %v356_v52  ;;  %p518_p0 = pnand (%p333_p9), %p517_p13, %p511_p10 }
 0x307   : > { %388 = vst [vmem:[%s660_s2 + $0x20] sm:$0xff] %v380_v51 }
 0x308   : > { %389 = vst [vmem:[%s660_s2 + $0x28] sm:$0xff] %v381_v54  ;;  %v383_v58 = vmul.f32 %v375_v56, %v357_v53  ;;  %390 = vst [vmem:[%s660_s2 + $0x30] sm:$0xff] %v382_v57  ;;  %335 = sbr.rel (!%p333_p9) target bundleno = 764 (0x2fc), region = 75 }
 0x30a   : > { %391 = vst [vmem:[%s660_s2 + $0x38] sm:$0xff] %v383_v58 }
 0x30f   :  { %521 = shalt.err (!%p518_p0)
}
 0x310   :  { %s522_s23 = scalar_lea.hbm %s712_s5, 2048 }
 0x311   :  { %p523_p1 = scmp.ne.s32.totalorder %s712_s5, %s522_s23  ;;  %p526_p2 = scmp.lt.u32.totalorder %s522_s23, %s712_s5 }
 0x313   :  { %p528_p3 = pnand %p526_p2, %p523_p1 }
 0x315   :  { %531 = shalt.err (!%p528_p3)
}
 0x316   :  { %403 = dma.vmem_to_hbm [thread:$0]  %s398_s9, 2048, %s712_s5, [#allocation5], %s553_s28, %s553_s28, %s554_s29  }
 0x317   :  { %542 = dma.done.wait [#allocation5], 2048  }
 0x318   :  { %543 = vsyncadd [#allocation5], 4294965248 }
 0x319   :  { %407 = vsyncpa [#allocation4], 1 }
 0x31a   :  { %408 = vsyncpa [#allocation5], 1 }

</bundles_post_ra>
